<compile_context>
chip_gen: v7x
topology: tpu7x:2x2x1
jax: 0.10.0
libtpu: 0.0.40
codegen_flags: <defaults>
</compile_context>

<pallas_src>
import functools

import jax
import jax.numpy as jnp
from jax import lax
from jax.experimental import pallas as pl
from jax.experimental.pallas import tpu as pltpu
import numpy as np


# ------------------------------ fused kernel -------------------------------- #

def fused_non_local_kernel(w_kqv_ref, wm_ref, x_ref, o_ref, view_ref, acc_ref,
                           *, cip, M, Tj, mxu_dtype):
    """grid = (batch, key_chunk).  Projection + view restructuring happen once
    per batch element (j == 0); scores/softmax/AV accumulate per key chunk; the
    conv_mask + residual + store happen at the last chunk."""
    if mxu_dtype is not None:
        cast = lambda a: a.astype(mxu_dtype)
    else:
        cast = lambda a: a

    j = pl.program_id(1)
    nj = pl.num_programs(1)

    # ---- once per batch element: stacked 1x1-conv projections + torch .view ----
    @pl.when(j == 0)
    def _init():
        x = cast(x_ref[0])                                    # (c, N)
        proj = jnp.dot(cast(w_kqv_ref[...]), x,
                       preferred_element_type=jnp.float32)    # (3*cip, N)
        lo, hi = proj[:, :M], proj[:, M:]                     # (3*cip, M) each
        # torch's .view(b, c, -1): row a of each (ci, N) projection becomes two
        # view rows via its lane halves.  Stack the halves along sublanes
        # (k_blk | q_blk | v_blk).  The block ordering is a fixed permutation
        # of the interleaved view order; the score / AV contractions are
        # invariant to it as long as k, q and v share it.
        view_ref[...] = cast(jnp.concatenate(
            [lo[0 * cip:1 * cip], hi[0 * cip:1 * cip],        # k_blk (2*cip, M)
             lo[1 * cip:2 * cip], hi[1 * cip:2 * cip],        # q_blk
             lo[2 * cip:3 * cip], hi[2 * cip:3 * cip]],       # v_blk
            axis=0))
        acc_ref[...] = jnp.zeros_like(acc_ref)

    # ---- per key chunk: scores, Softmax(dim=1), AV accumulation ----
    j0 = pl.multiple_of(j * Tj, Tj)
    k_c = view_ref[0:2 * cip, pl.ds(j0, Tj)]                  # (2*cip, Tj)
    q_a = view_ref[2 * cip:4 * cip, :]                        # (2*cip, M)
    v_c = view_ref[4 * cip:6 * cip, pl.ds(j0, Tj)]            # (2*cip, Tj)

    # Single full-depth MXU contraction, built directly in transposed layout:
    #   s_T[j, i] = sum_ch k_view[ch, j] * q_view[ch, i] == atten[i, j]
    dn = (((0,), (0,)), ((), ()))
    s_T = lax.dot_general(k_c, q_a, dn,
                          preferred_element_type=jnp.float32)             # (Tj, M)

    # nn.Softmax(dim=1) normalizes over the query index i == lane axis of s_T,
    # so each chunk row is fully normalized on its own (no online softmax).
    s_T = s_T - jnp.max(s_T, axis=-1, keepdims=True)
    e = jnp.exp(s_T)                                                       # (Tj, M)
    denom = jnp.sum(e, axis=-1, keepdims=True)                             # (Tj, 1)

    if Tj % 8 == 0:
        # Fold the denominator into V: c*Tj multiplies instead of Tj*M, and no
        # live (Tj, M) probability matrix.  The (Tj,1)->(1,Tj) move is done via
        # an (8,128)-aligned lane-broadcast + transpose (row 0 of the result).
        denom_row = jnp.transpose(jnp.broadcast_to(denom, (Tj, 128)))[0:1, :]
        v_s = v_c * pl.reciprocal(denom_row, approx=False)                 # (2*cip, Tj)
        p = e
    else:  # unaligned fallback: normalize the score slab directly (exact).
        v_s = v_c
        p = e * pl.reciprocal(denom, approx=False)

    acc_ref[...] += jnp.dot(cast(v_s), cast(p),
                            preferred_element_type=jnp.float32)            # (2*cip, M)

    # ---- once per batch element: un-view, conv_mask, residual, single store ----
    @pl.when(j == nj - 1)
    def _finalize():
        o_view = acc_ref[...]                                              # (2*cip, M)
        av = jnp.concatenate([o_view[:cip], o_view[cip:]], axis=1)         # (cip, N)
        mask = jnp.dot(cast(wm_ref[...]), cast(av),
                       preferred_element_type=jnp.float32)                 # (c, N)
        o_ref[0] = (x_ref[0].astype(jnp.float32) + mask).astype(o_ref.dtype)


# -------------------------------- wrapper ----------------------------------- #

@functools.partial(jax.jit, static_argnames=("mxu_dtype", "key_chunk"))
def non_local_pallas(x, wk, wq, wv, wm, *, mxu_dtype=jnp.bfloat16, key_chunk=None):
    b, c, h, w = x.shape
    ci = c // 2
    assert c == 2 * ci, "Non_Local requires an even channel count"
    N = h * w
    assert N % 2 == 0, "Non_Local requires an even number of spatial positions"
    M = N // 2                       # what torch's .view(b, c, -1) produces

    # Pad inter_channel up to a sublane multiple so every per-group slice of the
    # stacked projection is an (8,128)-aligned view (zero weight rows/columns
    # contribute nothing to any contraction).
    cip = ((ci + 7) // 8) * 8
    pad = cip - ci
    pad_rows = (lambda m: jnp.pad(m, ((0, pad), (0, 0)))) if pad else (lambda m: m)
    w_kqv = jnp.concatenate([pad_rows(wk), pad_rows(wq), pad_rows(wv)], axis=0)  # (3*cip, c)
    wm_p = jnp.pad(wm, ((0, 0), (0, pad))) if pad else wm                        # (c, cip)

    # Key-axis chunking: keep the whole (M, M) score slab resident for moderate
    # M (v5e/v6e: 128 MiB VMEM); chunk it for v7x-sized problems (64 MiB VMEM).
    if key_chunk is None:
        key_chunk = M if M <= 1024 else next(
            (t for t in (512, 256, 128) if M % t == 0), M)
    Tj = key_chunk
    assert M % Tj == 0, "key_chunk must divide h*w/2"
    nj = M // Tj

    xf = x.reshape(b, c, N)
    view_dtype = mxu_dtype if mxu_dtype is not None else jnp.float32

    kernel = functools.partial(fused_non_local_kernel, cip=cip, M=M, Tj=Tj,
                               mxu_dtype=mxu_dtype)

    out = pl.pallas_call(
        kernel,
        out_shape=jax.ShapeDtypeStruct((b, c, N), x.dtype),
        grid=(b, nj),
        in_specs=[pl.BlockSpec((3 * cip, c), lambda i, j: (0, 0)),
                  pl.BlockSpec((c, cip), lambda i, j: (0, 0)),
                  pl.BlockSpec((1, c, N), lambda i, j: (i, 0, 0))],
        out_specs=pl.BlockSpec((1, c, N), lambda i, j: (i, 0, 0)),
        scratch_shapes=[pltpu.VMEM((6 * cip, M), view_dtype),    # k|q|v view stack
                        pltpu.VMEM((2 * cip, M), jnp.float32)],  # AV accumulator
        # out = x + mask has the same shape/dtype as xf: reuse its HBM buffer.
        input_output_aliases={2: 0},
        compiler_params=pltpu.CompilerParams(
            dimension_semantics=("parallel", "arbitrary"),
            # v5e/v6e have 128 MiB physical VMEM; raise the default scoped cap.
            # On v7x (64 MiB) large-M problems rely on key_chunk to stay small.
            vmem_limit_bytes=96 * 1024 * 1024),
    )(w_kqv, wm_p, xf)

    return out.reshape(b, c, h, w)


# --------------------------- pure-JAX reference ------------------------------ #

def non_local_ref(x, wk, wq, wv, wm):
    b, c, h, w = x.shape
    ci = c // 2
    xf = x.reshape(b, c, h * w)
    key = jnp.einsum('oc,bcn->bon', wk, xf)                # (b, ci, N)
    qry = jnp.einsum('oc,bcn->bon', wq, xf)
    val = jnp.einsum('oc,bcn->bon', wv, xf)
    key_v = key.reshape(b, c, -1)                          # (b, c, M)
    qry_v = qry.reshape(b, c, -1).transpose(0, 2, 1)       # (b, M, c)
    val_v = val.reshape(b, c, -1).transpose(0, 2, 1)       # (b, M, c)
    att = jnp.einsum('bmc,bcn->bmn', qry_v, key_v)         # (b, M, M)
    att = jax.nn.softmax(att, axis=1)                      # Softmax(dim=1)
    mask = jnp.einsum('bmn,bnc->bmc', att, val_v)          # (b, M, c)
    mask = mask.transpose(0, 2, 1).reshape(b, ci, h, w)
    mask = jnp.einsum('oc,bchw->bohw', wm, mask)
    return x + mask


# ---------------------------------- main ------------------------------------- #

if __name__ == "__main__":
    # Small shapes consistent with the module: in_channel=8 -> inter_channel=4.
    B, C, H, W = 2, 8, 16, 16
    CI = C // 2

    root = jax.random.PRNGKey(0)
    kx, kk, kq, kv, km = jax.random.split(root, 5)
    x = jax.random.normal(kx, (B, C, H, W), dtype=jnp.float32)
    # Conv2d(k=1, bias=False) weights, squeezed to (out_ch, in_ch).
    wk = jax.random.normal(kk, (CI, C), dtype=jnp.float32) * 0.2
    wq = jax.random.normal(kq, (CI, C), dtype=jnp.float32) * 0.2
    wv = jax.random.normal(kv, (CI, C), dtype=jnp.float32) * 0.2
    wm = jax.random.normal(km, (C, CI), dtype=jnp.float32) * 0.2

    ref = jax.block_until_ready(non_local_ref(x, wk, wq, wv, wm))

    # fp32 parity mode (exact softmax denominator, f32 MXU operands).
    out_f32 = jax.block_until_ready(
        non_local_pallas(x, wk, wq, wv, wm, mxu_dtype=None))
    if not np.allclose(np.asarray(out_f32), np.asarray(ref), rtol=5e-3, atol=5e-3):
        raise AssertionError("fp32-mode Pallas output does not match reference")

    # Default production mode (bf16 MXU operands) — documented looser tolerance.
    out_bf16 = jax.block_until_ready(non_local_pallas(x, wk, wq, wv, wm))
    if not np.allclose(np.asarray(out_bf16), np.asarray(ref), rtol=5e-2, atol=5e-2):
        raise AssertionError("bf16-mode Pallas output not within bf16 tolerance")

    # Exercise the key-chunked (v7x-sized) path: larger spatial extent, 2 chunks.
    x2 = jax.random.normal(jax.random.PRNGKey(1), (B, C, 32, 32), dtype=jnp.float32)
    ref2 = jax.block_until_ready(non_local_ref(x2, wk, wq, wv, wm))
    out2 = jax.block_until_ready(
        non_local_pallas(x2, wk, wq, wv, wm, mxu_dtype=None, key_chunk=256))
    if not np.allclose(np.asarray(out2), np.asarray(ref2), rtol=5e-3, atol=5e-3):
        raise AssertionError("key-chunked Pallas output does not match reference")

    print("KERNEL_OK")
</pallas_src>

<mosaic_0001>
module attributes {stable_mosaic.version = 11 : i64} {
  func.func @fused_non_local_kernel(%arg0: i32, %arg1: i32, %arg2: memref<24x8xf32, #tpu.memory_space<vmem>>, %arg3: memref<8x8xf32, #tpu.memory_space<vmem>>, %arg4: memref<1x8x256xf32, #tpu.memory_space<vmem>>, %arg5: memref<1x8x256xf32, #tpu.memory_space<vmem>>, %arg6: memref<48x128xf32, #tpu.memory_space<vmem>>, %arg7: memref<16x128xf32, #tpu.memory_space<vmem>>) attributes {dimension_semantics = [#tpu.dimension_semantics<parallel>, #tpu.dimension_semantics<arbitrary>], iteration_bounds = array<i64: 2, 1>, scalar_prefetch = 0 : i64, scratch_operands = 2 : i64, tpu.core_type = #tpu.core_type<tc>, window_params = [{pipeline_mode = #tpu.pipeline_mode<synchronous>, transform_indices = @transform_0, window_bounds = array<i64: 24, 8>}, {pipeline_mode = #tpu.pipeline_mode<synchronous>, transform_indices = @transform_1, window_bounds = array<i64: 8, 8>}, {transform_indices = @transform_2, window_bounds = array<i64: 1, 8, 256>}, {transform_indices = @transform_3, window_bounds = array<i64: 1, 8, 256>}]} {
    %c0_i32 = arith.constant 0 : i32
    %0 = arith.cmpi eq, %arg1, %c0_i32 : i32
    %1 = arith.extui %0 : i1 to i32
    %c0_i32_0 = arith.constant 0 : i32
    %2 = arith.cmpi ne, %1, %c0_i32_0 : i32
    scf.if %2 {
      %c0_11 = arith.constant 0 : index
      %c0_12 = arith.constant 0 : index
      %c0_13 = arith.constant 0 : index
      %32 = vector.load %arg4[%c0_11, %c0_12, %c0_13] : memref<1x8x256xf32, #tpu.memory_space<vmem>>, vector<1x8x256xf32>
      %33 = vector.shape_cast %32 : vector<1x8x256xf32> to vector<8x256xf32>
      %c0_14 = arith.constant 0 : index
      %c0_15 = arith.constant 0 : index
      %34 = vector.load %arg2[%c0_14, %c0_15] : memref<24x8xf32, #tpu.memory_space<vmem>>, vector<24x8xf32>
      %cst_16 = arith.constant dense<0.000000e+00> : vector<24x256xf32>
      %35 = tpu.matmul %34, %33, %cst_16 {dimension_numbers = #tpu.dot_dimension_numbers<[1], [0], [0], [1], [0, 0, 1, 1], [], []>} : vector<24x8xf32>, vector<8x256xf32>, vector<24x256xf32> -> vector<24x256xf32>
      %36 = vector.extract_strided_slice %35 {offsets = [0, 0], sizes = [24, 128], strides = [1, 1]} : vector<24x256xf32> to vector<24x128xf32>
      %37 = vector.extract_strided_slice %35 {offsets = [0, 128], sizes = [24, 128], strides = [1, 1]} : vector<24x256xf32> to vector<24x128xf32>
      %38 = vector.extract_strided_slice %36 {offsets = [0, 0], sizes = [8, 128], strides = [1, 1]} : vector<24x128xf32> to vector<8x128xf32>
      %39 = vector.extract_strided_slice %37 {offsets = [0, 0], sizes = [8, 128], strides = [1, 1]} : vector<24x128xf32> to vector<8x128xf32>
      %40 = vector.extract_strided_slice %36 {offsets = [8, 0], sizes = [8, 128], strides = [1, 1]} : vector<24x128xf32> to vector<8x128xf32>
      %41 = vector.extract_strided_slice %37 {offsets = [8, 0], sizes = [8, 128], strides = [1, 1]} : vector<24x128xf32> to vector<8x128xf32>
      %42 = vector.extract_strided_slice %36 {offsets = [16, 0], sizes = [8, 128], strides = [1, 1]} : vector<24x128xf32> to vector<8x128xf32>
      %43 = vector.extract_strided_slice %37 {offsets = [16, 0], sizes = [8, 128], strides = [1, 1]} : vector<24x128xf32> to vector<8x128xf32>
      %44 = tpu.concatenate %38, %39, %40, %41, %42, %43 in 0 : vector<8x128xf32>, vector<8x128xf32>, vector<8x128xf32>, vector<8x128xf32>, vector<8x128xf32>, vector<8x128xf32> -> vector<48x128xf32>
      %c0_17 = arith.constant 0 : index
      %c0_18 = arith.constant 0 : index
      %45 = vector.load %arg6[%c0_17, %c0_18] : memref<48x128xf32, #tpu.memory_space<vmem>>, vector<48x128xf32>
      tpu.vector_store %arg6[%c0_17, %c0_18], %44 {strides = array<i32>} : memref<48x128xf32, #tpu.memory_space<vmem>>, vector<48x128xf32>,
      %cst_19 = arith.constant 0.000000e+00 : f32
      %46 = vector.broadcast %cst_19 : f32 to vector<16x128xf32>
      %c0_20 = arith.constant 0 : index
      %c0_21 = arith.constant 0 : index
      %47 = vector.load %arg7[%c0_20, %c0_21] : memref<16x128xf32, #tpu.memory_space<vmem>>, vector<16x128xf32>
      tpu.vector_store %arg7[%c0_20, %c0_21], %46 {strides = array<i32>} : memref<16x128xf32, #tpu.memory_space<vmem>>, vector<16x128xf32>,
    } else {
    }
    %c128_i32 = arith.constant 128 : i32
    %3 = arith.muli %arg1, %c128_i32 : i32
    %4 = tpu.assume_multiple %3, 128 : i32
    %c0 = arith.constant 0 : index
    %5 = arith.index_cast %4 : i32 to index
    %6 = vector.load %arg6[%c0, %5] : memref<48x128xf32, #tpu.memory_space<vmem>>, vector<16x128xf32>
    %c16 = arith.constant 16 : index
    %c0_1 = arith.constant 0 : index
    %7 = vector.load %arg6[%c16, %c0_1] : memref<48x128xf32, #tpu.memory_space<vmem>>, vector<16x128xf32>
    %c32 = arith.constant 32 : index
    %8 = arith.index_cast %4 : i32 to index
    %9 = vector.load %arg6[%c32, %8] : memref<48x128xf32, #tpu.memory_space<vmem>>, vector<16x128xf32>
    %cst = arith.constant dense<0.000000e+00> : vector<128x128xf32>
    %10 = tpu.matmul %6, %7, %cst {dimension_numbers = #tpu.dot_dimension_numbers<[0], [0], [1], [1], [0, 1, 1, 1], [], []>} : vector<16x128xf32>, vector<16x128xf32>, vector<128x128xf32> -> vector<128x128xf32>
    %cst_2 = arith.constant dense<0xFF800000> : vector<128xf32>
    %11 = vector.multi_reduction <maximumf>, %10, %cst_2 [1] : vector<128x128xf32> to vector<128xf32>
    %12 = vector.shape_cast %11 : vector<128xf32> to vector<128x1xf32>
    %13 = vector.broadcast %12 : vector<128x1xf32> to vector<128x128xf32>
    %14 = arith.subf %10, %13 : vector<128x128xf32>
    %15 = math.exp %14 : vector<128x128xf32>
    %cst_3 = arith.constant dense<0.000000e+00> : vector<128xf32>
    %16 = vector.multi_reduction <add>, %15, %cst_3 [1] : vector<128x128xf32> to vector<128xf32>
    %17 = vector.shape_cast %16 : vector<128xf32> to vector<128x1xf32>
    %18 = vector.shape_cast %17 : vector<128x1xf32> to vector<128x1xf32>
    %19 = vector.broadcast %18 : vector<128x1xf32> to vector<128x128xf32>
    %20 = tpu.transpose %19, [1, 0] : vector<128x128xf32> -> vector<128x128xf32>
    %21 = vector.extract_strided_slice %20 {offsets = [0, 0], sizes = [1, 128], strides = [1, 1]} : vector<128x128xf32> to vector<1x128xf32>
    %22 = tpu.reciprocal %21 : vector<1x128xf32> -> vector<1x128xf32>
    %23 = vector.broadcast %22 : vector<1x128xf32> to vector<16x128xf32>
    %24 = arith.mulf %9, %23 : vector<16x128xf32>
    %c0_4 = arith.constant 0 : index
    %c0_5 = arith.constant 0 : index
    %25 = vector.load %arg7[%c0_4, %c0_5] : memref<16x128xf32, #tpu.memory_space<vmem>>, vector<16x128xf32>
    %cst_6 = arith.constant dense<0.000000e+00> : vector<16x128xf32>
    %26 = tpu.matmul %24, %15, %cst_6 {dimension_numbers = #tpu.dot_dimension_numbers<[1], [0], [0], [1], [0, 0, 1, 1], [], []>} : vector<16x128xf32>, vector<128x128xf32>, vector<16x128xf32> -> vector<16x128xf32>
    %27 = arith.addf %25, %26 : vector<16x128xf32>
    %c0_7 = arith.constant 0 : index
    %c0_8 = arith.constant 0 : index
    %28 = vector.load %arg7[%c0_7, %c0_8] : memref<16x128xf32, #tpu.memory_space<vmem>>, vector<16x128xf32>
    tpu.vector_store %arg7[%c0_7, %c0_8], %27 {strides = array<i32>} : memref<16x128xf32, #tpu.memory_space<vmem>>, vector<16x128xf32>,
    %c0_i32_9 = arith.constant 0 : i32
    %29 = arith.cmpi eq, %arg1, %c0_i32_9 : i32
    %30 = arith.extui %29 : i1 to i32
    %c0_i32_10 = arith.constant 0 : i32
    %31 = arith.cmpi ne, %30, %c0_i32_10 : i32
    scf.if %31 {
      %c0_11 = arith.constant 0 : index
      %c0_12 = arith.constant 0 : index
      %32 = vector.load %arg7[%c0_11, %c0_12] : memref<16x128xf32, #tpu.memory_space<vmem>>, vector<16x128xf32>
      %33 = vector.extract_strided_slice %32 {offsets = [0, 0], sizes = [8, 128], strides = [1, 1]} : vector<16x128xf32> to vector<8x128xf32>
      %34 = vector.extract_strided_slice %32 {offsets = [8, 0], sizes = [8, 128], strides = [1, 1]} : vector<16x128xf32> to vector<8x128xf32>
      %35 = tpu.concatenate %33, %34 in 1 : vector<8x128xf32>, vector<8x128xf32> -> vector<8x256xf32>
      %c0_13 = arith.constant 0 : index
      %c0_14 = arith.constant 0 : index
      %36 = vector.load %arg3[%c0_13, %c0_14] : memref<8x8xf32, #tpu.memory_space<vmem>>, vector<8x8xf32>
      %cst_15 = arith.constant dense<0.000000e+00> : vector<8x256xf32>
      %37 = tpu.matmul %36, %35, %cst_15 {dimension_numbers = #tpu.dot_dimension_numbers<[1], [0], [0], [1], [0, 0, 1, 1], [], []>} : vector<8x8xf32>, vector<8x256xf32>, vector<8x256xf32> -> vector<8x256xf32>
      %c0_16 = arith.constant 0 : index
      %c0_17 = arith.constant 0 : index
      %c0_18 = arith.constant 0 : index
      %38 = vector.load %arg4[%c0_16, %c0_17, %c0_18] : memref<1x8x256xf32, #tpu.memory_space<vmem>>, vector<1x8x256xf32>
      %39 = vector.shape_cast %38 : vector<1x8x256xf32> to vector<8x256xf32>
      %40 = arith.addf %39, %37 : vector<8x256xf32>
      %c0_19 = arith.constant 0 : index
      %c0_20 = arith.constant 0 : index
      %c0_21 = arith.constant 0 : index
      %41 = vector.load %arg5[%c0_19, %c0_20, %c0_21] : memref<1x8x256xf32, #tpu.memory_space<vmem>>, vector<1x8x256xf32>
      %42 = vector.shape_cast %41 : vector<1x8x256xf32> to vector<8x256xf32>
      %43 = vector.shape_cast %40 : vector<8x256xf32> to vector<1x8x256xf32>
      tpu.vector_store %arg5[%c0_19, %c0_20, %c0_21], %43 {strides = array<i32>} : memref<1x8x256xf32, #tpu.memory_space<vmem>>, vector<1x8x256xf32>,
    } else {
    }
    return
  }
  func.func @transform_0(%arg0: i32, %arg1: i32) -> (i32, i32) {
    %c0_i32 = arith.constant 0 : i32
    %c0_i32_0 = arith.constant 0 : i32
    %c0_i32_1 = arith.constant 0 : i32
    return %c0_i32, %c0_i32_0 : i32, i32
  }
  func.func @transform_1(%arg0: i32, %arg1: i32) -> (i32, i32) {
    %c0_i32 = arith.constant 0 : i32
    %c0_i32_0 = arith.constant 0 : i32
    %c0_i32_1 = arith.constant 0 : i32
    return %c0_i32, %c0_i32_0 : i32, i32
  }
  func.func @transform_2(%arg0: i32, %arg1: i32) -> (i32, i32, i32) {
    %c0_i32 = arith.constant 0 : i32
    %c0_i32_0 = arith.constant 0 : i32
    %c0_i32_1 = arith.constant 0 : i32
    return %arg0, %c0_i32, %c0_i32_0 : i32, i32, i32
  }
  func.func @transform_3(%arg0: i32, %arg1: i32) -> (i32, i32, i32) {
    %c0_i32 = arith.constant 0 : i32
    %c0_i32_0 = arith.constant 0 : i32
    %c0_i32_1 = arith.constant 0 : i32
    return %arg0, %c0_i32, %c0_i32_0 : i32, i32, i32
  }
}

</mosaic_0001>

<bundles_post_ra>
// kernel: non_local_pallas.1
= control target key start
LH: loop header
LB: loop body
LE: loop exit
PB: predicated region body
PF: predicated region fallthrough
CT: control target
= control target key end

     0   :  { %8 = vsyncpa [#allocation5], 0  ;;  %s1820_s0 = inlined_call_operand.hbm [shape: f32[24,8], index: 0, kind: input, shape index: {}]   ;;  %s1821_s1 = inlined_call_operand.hbm [shape: f32[8,8], index: 1, kind: input, shape index: {}]   ;;  %s1822_s2 = inlined_call_operand.hbm [shape: f32[2,8,256], index: 2, kind: input, shape index: {}, may-alias: {2,3}]   ;;  %s1823_s3 = inlined_call_operand.hbm [shape: f32[2,8,256], index: 3, kind: output, shape index: {}, may-alias: {2,3}]  }
   0x1   :  { %9 = vsyncpa [#allocation8], 0 }
   0x2   :  { %10 = vsyncpa [#allocation6], 0 }
   0x3   :  { %12 = vsyncpa [#allocation6 + $0x1], 0  ;;  %s1503_s12 = smov 0   ;;  %s1505_s13 = smov 0  }
   0x4   :  { %s1507_s14 = smov 0   ;;  %s1509_s15 = smov 0  }
   0x5   :  { %s1511_s16 = smov 0   ;;  %s1513_s17 = smov 0  }
   0x6 LB: > { %s1534_s18 = sadd.s32 4294967295, %s1474_s17   ;;  %s1003_s19 = sadd.s32 4294967294, %s1474_s17   ;;  %s1474_s17 = sphi %s1513_s17, %s18_s17   ;;  %s1470_s16 = sphi %s1511_s16, %s1846_s16   ;;  %s1466_s15 = sphi %s1509_s15, %s1845_s15   ;;  %s1462_s14 = sphi %s1507_s14, %s1844_s14   ;;  %s1458_s13 = sphi %s1505_s13, %s1843_s13   ;;  %s1454_s12 = sphi %s1503_s12, %s1842_s12  }
   0x7   : > { %p92_p0 = scmp.ne.s32.totalorder %s1458_s13, %s1454_s12  ;;  %p1824_p1 = scmp.eq.s32.totalorder %s1534_s18, 0 }
   0x8   : > { %p122_p3 = scmp.eq.s32.totalorder %s1003_s19, 1  ;;  %p1004_p5 = scmp.ge.s32.totalorder %s1474_s17, 1 }
   0x9   : > { %p1543_p4 = por %p1824_p1, %p92_p0  ;;  %p129_p7 = scmp.lt.s32.totalorder %s1474_s17, 3 }
   0xa   : > { %p1548_p6 = por %p122_p3, %p92_p0  ;;  %s1476_s23 = smov [#allocation4]  }
   0xb   : > { %s1827_s20 = scalar_select %p1543_p4, 1, 0 }
   0xc   : > { %s1828_s21 = scalar_select %p1548_p6, 1, 0 }
   0xd   : > { %p1553_p8 = pnand %p1004_p5, %p129_p7  ;;  %s141_s24 = sshll.u32 %s1476_s23, 4  ;;  %s1557_s24 = int_to_ptr.vmem [resolvable:$true] %s141_s24 }
   0xe   : > { %s1477_s26 = smov [#allocation7]   ;;  %s1298_s30 = scalar_lea.hbm %s1820_s0, 384 }
   0xf   : > { %p1190_p9 = pneg %p1553_p8  ;;  %s155_s27 = sshll.u32 %s1477_s26, 4  ;;  %s1568_s27 = int_to_ptr.vmem [resolvable:$true] %s155_s27 }
  0x10   : > { %p1299_p12 = scmp.ne.s32.totalorder %s1820_s0, %s1298_s30  ;;  %p1305_p5 = scmp.lt.u32.totalorder %s1298_s30, %s1820_s0 }
  0x11   : > { %p1564_p11 = pnand %p1190_p9, %p1824_p1 }
  0x13   : > { %p1300_p13 = pneg %p1564_p11 }
  0x15   : > { %p1301_p0 = pnand %p1300_p13, %p1299_p12 }
  0x17   : > { %p1302_p3 = pneg %p1301_p0 }
  0x19   : > { %p1307_p7 = pnand %p1305_p5, %p1302_p3 }
  0x1b   : > { %1310 = shalt.err (!%p1307_p7)
}
  0x1c   : > { %s1311_s8 = scalar_lea.vmem %s1557_s24, 384  ;;  %p1319_p2 = scmp.lt.s32.totalorder %s1557_s24, %s1557_s24 }
  0x1d   : > { %p1312_p9 = scmp.ne.s32.totalorder %s1557_s24, %s1311_s8  ;;  %p1320_p12 = scmp.lt.s32.totalorder %s1311_s8, %s1311_s8 }
  0x1f   : > { %p1314_p10 = pnand %p1312_p9, %p1300_p13  ;;  %p1321_p0 = por %p1320_p12, %p1319_p2 }
  0x21   : > { %p1315_p1 = pneg %p1314_p10 }
  0x23   : > { %p1322_p6 = pnand %p1321_p0, %p1315_p1 }
  0x25   : > { %1325 = shalt.err (!%p1322_p6)
}
  0x26   : > { %s1478_s9 = smov 128   ;;  %s1479_s10 = smov 8  }
  0x27   : > { %1193 = dma.hbm_to_vmem [thread:$0]  (!%p1564_p11), %s1820_s0, 384, %s1557_s24, [#allocation5], %s1478_s9, %s1478_s9, %s1479_s10  }
  0x28   : > { %s1326_s28 = scalar_lea.hbm %s1821_s1, 128 }
  0x29   : > { %p1327_p2 = scmp.ne.s32.totalorder %s1821_s1, %s1326_s28  ;;  %p1333_p10 = scmp.lt.u32.totalorder %s1326_s28, %s1821_s1 }
  0x2b   : > { %p1329_p1 = pnand %p1327_p2, %p1300_p13 }
  0x2d   : > { %p1330_p6 = pneg %p1329_p1 }
  0x2f   : > { %p1335_p3 = pnand %p1333_p10, %p1330_p6 }
  0x31   : > { %1338 = shalt.err (!%p1335_p3)
}
  0x32   : > { %s1339_s24 = scalar_lea.vmem %s1568_s27, 128  ;;  %p1347_p12 = scmp.lt.s32.totalorder %s1568_s27, %s1568_s27 }
  0x33   : > { %p1340_p5 = scmp.ne.s32.totalorder %s1568_s27, %s1339_s24  ;;  %p1348_p0 = scmp.lt.s32.totalorder %s1339_s24, %s1339_s24 }
  0x35   : > { %p1342_p7 = pnand %p1340_p5, %p1300_p13  ;;  %p1349_p2 = por %p1348_p0, %p1347_p12 }
  0x37   : > { %p1343_p9 = pneg %p1342_p7 }
  0x39   : > { %p1350_p1 = pnand %p1349_p2, %p1343_p9 }
  0x3b   : > { %1353 = shalt.err (!%p1350_p1)
}
  0x3c   : > { %1196 = dma.hbm_to_vmem [thread:$0]  (!%p1564_p11), %s1821_s1, 128, %s1568_s27, [#allocation8]  }
  0x3d   : > { %s30_s8 = sadd.s32 1, %s1470_s16  ;;  %s79_s9 = sadd.s32 1, %s1462_s14 }
  0x3e   : > { %p32_p13 = scmp.ge.s32.totalorder %s30_s8, 2  ;;  %p86_p6 = scmp.ne.s32.totalorder %s1462_s14, %s1458_s13 }
  0x3f   : > { %p87_p10 = scmp.eq.s32.totalorder %s1474_s17, 0  ;;  %p1207_p3 = scmp.lt.s32.totalorder %s1474_s17, 2 }
  0x40   : > { %s1848_s8 = smov (%p32_p13, %s30_s8), 0  ;;  %p1831_p7 = scmp.eq.s32.totalorder %s1534_s18, 1 }
  0x41   : > { %p88_p5 = por %p87_p10, %p86_p6  ;;  %s76_s10 = ssub.s32 %s1470_s16, %s1848_s8 }
  0x42   : > { %p1632_p9 = por %p1831_p7, %p86_p6  ;;  %s166_s11 = sand.u32 1, %s1474_s17  }
  0x43   : > { %p77_p12 = scmp.eq.s32.totalorder %s76_s10, 0  ;;  %s168_s19 = sand.u32 1, %s1462_s14  }
  0x44   : > { %s1832_s25 = scalar_select %p1632_p9, 1, 0 }
  0x45   : > { %s1041_s27 = sshll.u32 %s1470_s16, 8  ;;  %s1008_s26 = sshll.u32 %s168_s19, 4 }
  0x46   : > { %s1642_s23 = scalar_select %p77_p12, %s1462_s14, %s79_s9  }
  0x47   : > { %s1647_s30 = scalar_lea.hbm %s1822_s2, %s1041_s27  ;;  %p1649_p11 = pnand %p1207_p3, %p88_p5 }
  0x48   : > { %s170_s5 = scalar_lea.vmem [#allocation9], %s1008_s26  ;;  %s167_s6 = scalar_lea.sflag [#allocation5], %s166_s11 }
  0x49   : > { %s178_s24 = sshll.u32 %s170_s5, 4  ;;  %s1354_s7 = scalar_lea.hbm %s1647_s30, 256  ;;  %s1653_s24 = int_to_ptr.vmem [resolvable:$true] %s178_s24 }
  0x4a   : > { %p1355_p0 = scmp.ne.s32.totalorder %s1647_s30, %s1354_s7  ;;  %p1356_p2 = pneg %p1649_p11 }
  0x4b   : > { %s1359_s19 = scalar_lea.hbm %s1822_s2, 512  ;;  %p1360_p6 = scmp.lt.u32.totalorder %s1647_s30, %s1822_s2 }
  0x4c   : > { %p1357_p1 = pnand %p1356_p2, %p1355_p0  ;;  %p1361_p10 = scmp.lt.u32.totalorder %s1359_s19, %s1354_s7 }
  0x4d   : > { %p1363_p5 = scmp.lt.u32.totalorder %s1354_s7, %s1647_s30 }
  0x4e   : > { %p1358_p13 = pneg %p1357_p1  ;;  %p1362_p3 = por %p1361_p10, %p1360_p6 }
  0x50   : > { %p1364_p7 = por %p1363_p5, %p1362_p3 }
  0x52   : > { %p1365_p12 = pnand %p1364_p7, %p1358_p13 }
  0x54   : > { %1368 = shalt.err (!%p1365_p12)
}
  0x55   : > { %s1369_s11 = scalar_lea.vmem %s1653_s24, 256  ;;  %s1480_s26 = smov [#allocation9]  }
  0x56   : > { %p1370_p0 = scmp.ne.s32.totalorder %s1653_s24, %s1369_s11  ;;  %s1374_s29 = sshll.u32 %s1480_s26, 4  ;;  %s1375_s29 = int_to_ptr.vmem [resolvable:$false] %s1374_s29 }
  0x57   : > { %s1376_s5 = scalar_lea.vmem %s1375_s29, 512  ;;  %p1377_p4 = scmp.lt.s32.totalorder %s1653_s24, %s1375_s29 }
  0x58   : > { %p1372_p1 = pnand %p1370_p0, %p1356_p2  ;;  %p1378_p6 = scmp.lt.s32.totalorder %s1376_s5, %s1369_s11 }
  0x5a   : > { %p1373_p9 = pneg %p1372_p1  ;;  %p1379_p10 = por %p1378_p6, %p1377_p4 }
  0x5c   : > { %p1380_p3 = pnand %p1379_p10, %p1373_p9 }
  0x5e   : > { %1383 = shalt.err (!%p1380_p3)
}
  0x5f   : > { %1200 = dma.hbm_to_vmem [thread:$0]  (!%p1649_p11), %s1647_s30, 256, %s1653_s24, %s167_s6  }
  0x60   : > { %187 = sbr.rel (%p1553_p8) target bundleno = 1563 (0x61b), region = 32  ;;  %p1834_p2 = scmp.eq.s32.totalorder (!%p1553_p8), %s1534_s18, 0 }
  0x67   : > { %1437 = dma.done.wait (%p1834_p2), [#allocation5], 384   ;;  %p1835_p13 = pmov %p1834_p2 }
  0x68   : > { %p1836_p5 = pmov %p1834_p2 }
  0x69   : > { %1439 = vsyncadd (%p1835_p13), [#allocation5], 4294966912 }
  0x6a   : > { %1441 = dma.done.wait (%p1836_p5), [#allocation8], 128   ;;  %p1837_p4 = pmov %p1834_p2 }
  0x6b   : > { %s197_s30 = sand.u32 1, %s1534_s18   ;;  %s199_s4 = sand.u32 1, %s1458_s13  }
  0x6c   : > { %1443 = vsyncadd (%p1837_p4), [#allocation8], 4294967168  ;;  %s1694_s22 = sshll.u32 %s199_s4, 4  ;;  %s198_s24 = scalar_lea.sflag [#allocation5], %s197_s30 }
  0x6d   : > { %s201_s6 = scalar_lea.vmem [#allocation9], %s1694_s22  ;;  %p1838_p8 = scmp.ne.s32.totalorder %s1827_s20, 0 }
  0x6f   : > { %1445 = dma.done.wait (%p1838_p8), %s198_s24, 256  }
  0x70   : > { %1447 = vsyncadd (%p1838_p8), %s198_s24, 4294967040  ;;  %v1481_v0 = vmov 0.0   ;;  %v1701_v1 = vld [vmem:[%s201_s6 + $0x8] sm:$0xff]  ;;  %v1703_v2 = vld [vmem:[%s201_s6] sm:$0xff]  ;;  %vm233_vm0 = vcmask 64512   ;;  %vm376_vm1 = vcmask 130048  }
  0x71   : > { %307 = vmatprep.mubr.f32.mxu0 %v1481_v0  ;;  %v230_v3 = vld [vmem:[#allocation4] sm:$0xff]  ;;  %243 = vmatprep.subr.mxu0 %v1701_v1  ;;  %v231_v4 = vld [vmem:[#allocation4 + $0x8] sm:$0xff]  ;;  %v232_v42 = vld [vmem:[#allocation4 + $0x10] sm:$0xff]  ;;  %s1042_s18 = sshll.u32 %s1466_s15, 8  ;;  %s223_s20 = scalar_lea.vmem [#allocation10], %s1694_s22 }
  0x72   : > { %244 = vmatpush1.msra.mxu0 %v1703_v2  ;;  %s904_s7 = sshll.u32 %s223_s20, 4  ;;  %s1770_s19 = scalar_lea.hbm %s1823_s3, %s1042_s18  ;;  %s1772_s7 = int_to_ptr.vmem [resolvable:$true] %s904_s7 }
  0x73   : > { %1016 = vmatmul.mubr.msk.f32.vlgmr.msra.gmra.mrb[0].mxu0 %vm233_vm0, %v230_v3  ;;  %s890_s15 = scalar_lea.sflag [#allocation6], %s199_s4  ;;  %s1384_s27 = scalar_lea.vmem %s1772_s7, 256 }
  0x74   : > { %313 = vmatprep.mubr.f32.mxu0 %v1481_v0  ;;  %p1385_p9 = scmp.ne.s32.totalorder %s1772_s7, %s1384_s27  ;;  %p1839_p11 = scmp.ne.s32.totalorder %s1832_s25, 0 }
  0x75   : > { %s1482_s28 = smov [#allocation10]  }
  0x76   : > { %p1386_p7 = pnand %p1385_p9, %p1839_p11  ;;  %s1388_s11 = sshll.u32 %s1482_s28, 4  ;;  %s1389_s11 = int_to_ptr.vmem [resolvable:$false] %s1388_s11 }
  0x77   : > { %1017 = vmatmul.mubr.msk.f32.gmra.mrb[2].mxu0 %vm233_vm0, %v231_v4  ;;  %s1390_s26 = scalar_lea.vmem %s1389_s11, 512  ;;  %p1391_p0 = scmp.lt.s32.totalorder %s1772_s7, %s1389_s11 }
  0x78   : > { %319 = vmatprep.mubr.f32.mxu0 %v1481_v0  ;;  %p1387_p12 = pneg %p1386_p7  ;;  %p1392_p1 = scmp.lt.s32.totalorder %s1390_s26, %s1384_s27 }
  0x7a   : > { %p1393_p6 = por %p1392_p1, %p1391_p0 }
  0x7b   : > { %1018 = vmatmul.mubr.msk.f32.gmra.mrb[4].mxu0 %vm233_vm0, %v232_v42 }
  0x7c   : > { %p1394_p10 = pnand %p1393_p6, %p1387_p12 }
 0x146   : > { %v309_v5 = vpop.f32.mrb[0].mxu0 }
 0x147   : > { %344 = vxpose.xlu0.b32.start [1/2] (short) %v309_v5, 128  ;;  %v311_v6 = vpop.f32.mrb[1].mxu0 }
 0x14a   : > { %v315_v7 = vpop.f32.mrb[2].mxu0 }
 0x14b   : > { %345 = vxpose.xlu0.b32.end [2/2] (short) %v311_v6, 128  ;;  %v317_v8 = vpop.f32.mrb[3].mxu0 }
 0x14c   : > { %v1142_v9 = vpack.c.bf16 %v317_v8, %v315_v7 }
 0x14e   : > { %1143 = vmatprep.subr.bf16.mxu1 %v1142_v9 }
 0x14f   : > { %1145 = vmatpush3.bf16.msra.mxu1 %v1142_v9 }
 0x1c7   : > { %v360_v10 = vpop.trf.xlu0 }
 0x1c8   : > { %1083 = vmatprep.mubr.msk.f32.mxu1 %vm376_vm1, %v360_v10 }
 0x1cb   : > { %v361_v11 = vpop.trf.xlu0 }
 0x1cc   : > { %1084 = vmatmul.mubr.msk.f32.vlgmr.msra.gmra.mrb[0].mxu1 %vm376_vm1, %v361_v11 }
 0x1cf   : > { %v362_v12 = vpop.trf.xlu0 }
 0x1d0   : > { %1086 = vmatprep.mubr.msk.f32.mxu1 %vm376_vm1, %v362_v12 }
 0x1d3   : > { %v363_v13 = vpop.trf.xlu0 }
 0x1d4   : > { %1087 = vmatmul.mubr.msk.f32.gmra.mrb[2].mxu1 %vm376_vm1, %v363_v13 }
 0x1d7   : > { %v364_v14 = vpop.trf.xlu0 }
 0x1d8   : > { %1089 = vmatprep.mubr.msk.f32.mxu1 %vm376_vm1, %v364_v14 }
 0x1db   : > { %v365_v15 = vpop.trf.xlu0 }
 0x1dc   : > { %1090 = vmatmul.mubr.msk.f32.gmra.mrb[4].mxu1 %vm376_vm1, %v365_v15 }
 0x1df   : > { %v366_v16 = vpop.trf.xlu0 }
 0x1e0   : > { %1092 = vmatprep.mubr.msk.f32.mxu1 %vm376_vm1, %v366_v16 }
 0x1e3   : > { %v367_v17 = vpop.trf.xlu0 }
 0x1e4   : > { %1093 = vmatmul.mubr.msk.f32.gmra.mrb[6].mxu1 %vm376_vm1, %v367_v17 }
 0x1e7   : > { %v368_v18 = vpop.trf.xlu0 }
 0x1e8   : > { %1095 = vmatprep.mubr.msk.f32.mxu1 %vm376_vm1, %v368_v18 }
 0x1eb   : > { %v369_v19 = vpop.trf.xlu0 }
 0x1ec   : > { %1096 = vmatmul.mubr.msk.f32.gmra.mrb[8].mxu1 %vm376_vm1, %v369_v19 }
 0x1ef   : > { %v370_v20 = vpop.trf.xlu0 }
 0x1f0   : > { %1098 = vmatprep.mubr.msk.f32.mxu1 %vm376_vm1, %v370_v20 }
 0x1f3   : > { %v371_v21 = vpop.trf.xlu0 }
 0x1f4   : > { %1099 = vmatmul.mubr.msk.f32.gmra.mrb[10].mxu1 %vm376_vm1, %v371_v21 }
 0x1f7   : > { %v372_v22 = vpop.trf.xlu0 }
 0x1f8   : > { %1101 = vmatprep.mubr.msk.f32.mxu1 %vm376_vm1, %v372_v22 }
 0x1fb   : > { %v373_v23 = vpop.trf.xlu0 }
 0x1fc   : > { %1102 = vmatmul.mubr.msk.f32.gmra.mrb[12].mxu1 %vm376_vm1, %v373_v23 }
 0x1ff   : > { %v374_v24 = vpop.trf.xlu0 }
 0x200   : > { %1104 = vmatprep.mubr.msk.f32.mxu1 %vm376_vm1, %v374_v24 }
 0x203   : > { %v375_v25 = vpop.trf.xlu0 }
 0x204   : > { %1105 = vmatmul.mubr.msk.f32.gmra.mrb[14].mxu1 %vm376_vm1, %v375_v25 }
 0x205   : > { %876 = vmatprep.mubr.f32.mxu1 %v1481_v0 }
 0x29f   : > { %v1085_v26 = vpop.f32.mrb[0].mxu1 }
 0x2a0   : > { %572 = vmax.xlane.f32.xlu1 %v1085_v26  ;;  %v491_v27 = vpop.f32.mrb[1].mxu1 }
 0x2a4   : > { %570 = vmax.xlane.f32.xlu1 %v491_v27 }
 0x2a7   : > { %v1088_v28 = vpop.f32.mrb[2].mxu1 }
 0x2a8   : > { %576 = vmax.xlane.f32.xlu1 %v1088_v28  ;;  %v501_v29 = vpop.f32.mrb[3].mxu1 }
 0x2a9   : > { %574 = vmax.xlane.f32.xlu0 %v501_v29 }
 0x2af   : > { %v1091_v30 = vpop.f32.mrb[4].mxu1 }
 0x2b0   : > { %580 = vmax.xlane.f32.xlu1 %v1091_v30  ;;  %v511_v31 = vpop.f32.mrb[5].mxu1 }
 0x2b4   : > { %578 = vmax.xlane.f32.xlu1 %v511_v31 }
 0x2b7   : > { %v1094_v32 = vpop.f32.mrb[6].mxu1 }
 0x2b8   : > { %584 = vmax.xlane.f32.xlu1 %v1094_v32  ;;  %v1725_v33 = vpop.f32.mrb[7].mxu1 }
 0x2bc   : > { %582 = vmax.xlane.f32.xlu1 %v1725_v33 }
 0x2bf   : > { %v1728_v34 = vpop.f32.mrb[8].mxu1 }
 0x2c0   : > { %588 = vmax.xlane.f32.xlu1 %v1728_v34  ;;  %v1731_v35 = vpop.f32.mrb[9].mxu1 }
 0x2c4   : > { %586 = vmax.xlane.f32.xlu1 %v1731_v35 }
 0x2c7   : > { %v1734_v36 = vpop.f32.mrb[10].mxu1 }
 0x2c8   : > { %592 = vmax.xlane.f32.xlu1 %v1734_v36  ;;  %v1737_v37 = vpop.f32.mrb[11].mxu1 }
 0x2cc   : > { %590 = vmax.xlane.f32.xlu1 %v1737_v37 }
 0x2cf   : > { %v1740_v38 = vpop.f32.mrb[12].mxu1 }
 0x2d0   : > { %596 = vmax.xlane.f32.xlu1 %v1740_v38  ;;  %v1743_v39 = vpop.f32.mrb[13].mxu1 }
 0x2d4   : > { %594 = vmax.xlane.f32.xlu1 %v1743_v39 }
 0x2d7   : > { %v1746_v40 = vpop.f32.mrb[14].mxu1 }
 0x2d8   : > { %600 = vmax.xlane.f32.xlu1 %v1746_v40  ;;  %v1749_v41 = vpop.f32.mrb[15].mxu1 }
 0x2dc   : > { %598 = vmax.xlane.f32.xlu1 %v1749_v41 }
 0x32d   : > { %v573_v43 = vpop.xlane.xlu1 %572 }
 0x32e   : > { %v603_v44 = vsub.f32 %v1085_v26, %v573_v43 }
 0x330   : > { %v620_v45 = vmul.f32 1.442695, %v603_v44 }
 0x331   : > { %v571_v46 = vpop.xlane.xlu1 %570 }
 0x332   : > { %1264 = vpow2.f32 %v620_v45  ;;  %v602_v47 = vsub.f32 %v491_v27, %v571_v46 }
 0x334   : > { %v618_v48 = vmul.f32 1.442695, %v602_v47 }
 0x335   : > { %v577_v49 = vpop.xlane.xlu1 %576 }
 0x336   : > { %1266 = vpow2.f32 %v618_v48  ;;  %v605_v50 = vsub.f32 %v1088_v28, %v577_v49  ;;  %v575_v51 = vpop.xlane.xlu0 %574 }
 0x337   : > { %v604_v52 = vsub.f32 %v501_v29, %v575_v51 }
 0x338   : > { %v624_v53 = vmul.f32 1.442695, %v605_v50 }
 0x339   : > { %v622_v54 = vmul.f32 1.442695, %v604_v52 }
 0x33a   : > { %1268 = vpow2.f32 %v624_v53 }
 0x33b   : > { %1270 = vpow2.f32 %v622_v54 }
 0x33c   : > { %v1265_v55 = vpop.eup %1264 }
 0x33d   : > { %v581_v56 = vpop.xlane.xlu1 %580  ;;  %652 = vadd.xlane.f32.xlu1 %v1265_v55 }
 0x33e   : > { %v607_v57 = vsub.f32 %v1091_v30, %v581_v56 }
 0x340   : > { %v1267_v58 = vpop.eup %1266  ;;  %v628_v59 = vmul.f32 1.442695, %v607_v57 }
 0x341   : > { %v579_v60 = vpop.xlane.xlu1 %578  ;;  %650 = vadd.xlane.f32.xlu1 %v1267_v58  ;;  %v1146_v61 = vpack.c.bf16 %v1265_v55, %v1267_v58  ;;  %v321_v55 = vpop.f32.mrb[4].mxu0 }
 0x342   : > { %1272 = vpow2.f32 %v628_v59  ;;  %v606_v62 = vsub.f32 %v511_v31, %v579_v60  ;;  %v323_v59 = vpop.f32.mrb[5].mxu0 }
 0x343   : > { %1147 = vmatprep.subr.bf16.mxu0 %v1146_v61 }
 0x344   : > { %v1269_v63 = vpop.eup %1268  ;;  %v626_v0 = vmul.f32 1.442695, %v606_v62  ;;  %1149 = vmatpush3.bf16.msra.mxu0 %v1146_v61 }
 0x345   : > { %v1271_v3 = vpop.eup %1270  ;;  %v585_v4 = vpop.xlane.xlu1 %584  ;;  %656 = vadd.xlane.f32.xlu1 %v1269_v63 }
 0x346   : > { %1274 = vpow2.f32 %v626_v0  ;;  %v609_v5 = vsub.f32 %v1094_v32, %v585_v4  ;;  %v1150_v6 = vpack.c.bf16 %v1269_v63, %v1271_v3 }
 0x348   : > { %v632_v7 = vmul.f32 1.442695, %v609_v5  ;;  %1151 = vmatprep.subr.bf16.mxu0 %v1150_v6 }
 0x349   : > { %1153 = vmatpush3.bf16.msra.mxu0 %v1150_v6  ;;  %v583_v8 = vpop.xlane.xlu1 %582  ;;  %654 = vadd.xlane.f32.xlu1 %v1271_v3 }
 0x34a   : > { %1276 = vpow2.f32 %v632_v7  ;;  %v608_v9 = vsub.f32 %v1725_v33, %v583_v8 }
 0x34c   : > { %v1273_v10 = vpop.eup %1272  ;;  %v630_v11 = vmul.f32 1.442695, %v608_v9 }
 0x34d   : > { %v589_v12 = vpop.xlane.xlu1 %588  ;;  %660 = vadd.xlane.f32.xlu1 %v1273_v10 }
 0x34e   : > { %1278 = vpow2.f32 %v630_v11  ;;  %v611_v13 = vsub.f32 %v1728_v34, %v589_v12 }
 0x350   : > { %v1275_v14 = vpop.eup %1274  ;;  %v636_v15 = vmul.f32 1.442695, %v611_v13 }
 0x351   : > { %v587_v16 = vpop.xlane.xlu1 %586  ;;  %658 = vadd.xlane.f32.xlu1 %v1275_v14  ;;  %v1154_v17 = vpack.c.bf16 %v1273_v10, %v1275_v14  ;;  %v715_v10 = vlaneseq }
 0x352   : > { %1280 = vpow2.f32 %v636_v15  ;;  %v610_v18 = vsub.f32 %v1731_v35, %v587_v16 }
 0x353   : > { %1155 = vmatprep.subr.bf16.mxu0 %v1154_v17  ;;  %v716_v11 = vshrl.u32 %v715_v10, 7 }
 0x354   : > { %v1277_v19 = vpop.eup %1276  ;;  %v634_v20 = vmul.f32 1.442695, %v610_v18  ;;  %1157 = vmatpush3.bf16.msra.mxu0 %v1154_v17  ;;  %v807_v18 = vld [vmem:[#allocation7] sm:$0xff] }
 0x355   : > { %v593_v21 = vpop.xlane.xlu1 %592  ;;  %664 = vadd.xlane.f32.xlu1 %v1277_v19  ;;  %v717_v12 = vsub.s32 0, %v716_v11 }
 0x356   : > { %1282 = vpow2.f32 %v634_v20  ;;  %v613_v22 = vsub.f32 %v1734_v36, %v593_v21 }
 0x358   : > { %v1279_v23 = vpop.eup %1278  ;;  %v640_v24 = vmul.f32 1.442695, %v613_v22 }
 0x359   : > { %v591_v25 = vpop.xlane.xlu1 %590  ;;  %662 = vadd.xlane.f32.xlu1 %v1279_v23  ;;  %v1158_v26 = vpack.c.bf16 %v1277_v19, %v1279_v23 }
 0x35a   : > { %1284 = vpow2.f32 %v640_v24  ;;  %v612_v27 = vsub.f32 %v1737_v37, %v591_v25 }
 0x35b   : > { %1159 = vmatprep.subr.bf16.mxu0 %v1158_v26 }
 0x35c   : > { %v1281_v28 = vpop.eup %1280  ;;  %v638_v29 = vmul.f32 1.442695, %v612_v27  ;;  %1161 = vmatpush3.bf16.msra.mxu0 %v1158_v26 }
 0x35d   : > { %v597_v30 = vpop.xlane.xlu1 %596  ;;  %668 = vadd.xlane.f32.xlu1 %v1281_v28 }
 0x35e   : > { %1286 = vpow2.f32 %v638_v29  ;;  %v615_v31 = vsub.f32 %v1740_v38, %v597_v30 }
 0x360   : > { %v1283_v32 = vpop.eup %1282  ;;  %v644_v33 = vmul.f32 1.442695, %v615_v31 }
 0x361   : > { %v595_v34 = vpop.xlane.xlu1 %594  ;;  %666 = vadd.xlane.f32.xlu1 %v1283_v32  ;;  %v1162_v35 = vpack.c.bf16 %v1281_v28, %v1283_v32 }
 0x362   : > { %1288 = vpow2.f32 %v644_v33  ;;  %v614_v36 = vsub.f32 %v1743_v39, %v595_v34 }
 0x363   : > { %1163 = vmatprep.subr.bf16.mxu0 %v1162_v35 }
 0x364   : > { %v1285_v42 = vpop.eup %1284  ;;  %v642_v37 = vmul.f32 1.442695, %v614_v36  ;;  %1165 = vmatpush3.bf16.msra.mxu0 %v1162_v35 }
 0x365   : > { %v601_v43 = vpop.xlane.xlu1 %600  ;;  %672 = vadd.xlane.f32.xlu1 %v1285_v42 }
 0x366   : > { %1290 = vpow2.f32 %v642_v37  ;;  %v617_v44 = vsub.f32 %v1746_v40, %v601_v43 }
 0x368   : > { %v1287_v45 = vpop.eup %1286  ;;  %v648_v46 = vmul.f32 1.442695, %v617_v44 }
 0x369   : > { %670 = vadd.xlane.f32.xlu1 %v1287_v45  ;;  %v599_v38 = vpop.xlane.xlu1 %598  ;;  %v1166_v47 = vpack.c.bf16 %v1285_v42, %v1287_v45 }
 0x36a   : > { %1292 = vpow2.f32 %v648_v46  ;;  %v616_v48 = vsub.f32 %v1749_v41, %v599_v38 }
 0x36b   : > { %1167 = vmatprep.subr.bf16.mxu0 %v1166_v47 }
 0x36c   : > { %v1289_v49 = vpop.eup %1288  ;;  %v646_v39 = vmul.f32 1.442695, %v616_v48  ;;  %1169 = vmatpush3.bf16.msra.mxu0 %v1166_v47 }
 0x36d   : > { %676 = vadd.xlane.f32.xlu0 %v1289_v49 }
 0x36e   : > { %1294 = vpow2.f32 %v646_v39 }
 0x370   : > { %v1291_v50 = vpop.eup %1290 }
 0x371   : > { %674 = vadd.xlane.f32.xlu1 %v1291_v50  ;;  %v1170_v51 = vpack.c.bf16 %v1289_v49, %v1291_v50 }
 0x373   : > { %1171 = vmatprep.subr.bf16.mxu0 %v1170_v51 }
 0x374   : > { %v1293_v52 = vpop.eup %1292  ;;  %1173 = vmatpush3.bf16.msra.mxu0 %v1170_v51 }
 0x375   : > { %680 = vadd.xlane.f32.xlu0 %v1293_v52 }
 0x378   : > { %v1295_v40 = vpop.eup %1294 }
 0x379   : > { %678 = vadd.xlane.f32.xlu1 %v1295_v40  ;;  %v1174_v53 = vpack.c.bf16 %v1293_v52, %v1295_v40 }
 0x37b   : > { %1175 = vmatprep.subr.bf16.mxu0 %v1174_v53 }
 0x37c   : > { %1177 = vmatpush3.bf16.msra.mxu0 %v1174_v53 }
 0x3ca   : > { %v653_v54 = vpop.xlane.xlu1 %652 }
 0x3ce   : > { %v651_v41 = vpop.xlane.xlu1 %650 }
 0x3cf   : > { %682 = vxpose.xlu1.b32.start [1/16] (narrow) %v651_v41, 8 }
 0x3d2   : > { %v657_v56 = vpop.xlane.xlu1 %656 }
 0x3d3   : > { %683 = vxpose.xlu1.b32.cont [2/16] (narrow) %v653_v54, 8 }
 0x3d6   : > { %v655_v57 = vpop.xlane.xlu1 %654 }
 0x3d7   : > { %684 = vxpose.xlu1.b32.cont [3/16] (narrow) %v655_v57, 8 }
 0x3da   : > { %v661_v58 = vpop.xlane.xlu1 %660 }
 0x3db   : > { %685 = vxpose.xlu1.b32.cont [4/16] (narrow) %v657_v56, 8 }
 0x3de   : > { %v659_v60 = vpop.xlane.xlu1 %658 }
 0x3df   : > { %686 = vxpose.xlu1.b32.cont [5/16] (narrow) %v659_v60, 8 }
 0x3e2   : > { %v665_v61 = vpop.xlane.xlu1 %664 }
 0x3e3   : > { %687 = vxpose.xlu1.b32.cont [6/16] (narrow) %v661_v58, 8 }
 0x3e6   : > { %v663_v62 = vpop.xlane.xlu1 %662 }
 0x3e7   : > { %688 = vxpose.xlu1.b32.cont [7/16] (narrow) %v663_v62, 8 }
 0x3ea   : > { %v669_v63 = vpop.xlane.xlu1 %668 }
 0x3eb   : > { %689 = vxpose.xlu1.b32.cont [8/16] (narrow) %v665_v61, 8 }
 0x3ee   : > { %v667_v0 = vpop.xlane.xlu1 %666 }
 0x3ef   : > { %690 = vxpose.xlu1.b32.cont [9/16] (narrow) %v667_v0, 8 }
 0x3f2   : > { %v673_v3 = vpop.xlane.xlu1 %672 }
 0x3f3   : > { %691 = vxpose.xlu1.b32.cont [10/16] (narrow) %v669_v63, 8 }
 0x3f6   : > { %v671_v4 = vpop.xlane.xlu1 %670 }
 0x3f7   : > { %692 = vxpose.xlu1.b32.cont [11/16] (narrow) %v671_v4, 8 }
 0x3fa   : > { %v677_v6 = vpop.xlane.xlu0 %676 }
 0x3fb   : > { %693 = vxpose.xlu1.b32.cont [12/16] (narrow) %v673_v3, 8 }
 0x3fe   : > { %v675_v5 = vpop.xlane.xlu1 %674 }
 0x3ff   : > { %694 = vxpose.xlu1.b32.cont [13/16] (narrow) %v675_v5, 8 }
 0x402   : > { %v681_v8 = vpop.xlane.xlu0 %680 }
 0x403   : > { %695 = vxpose.xlu1.b32.cont [14/16] (narrow) %v677_v6, 8 }
 0x406   : > { %v679_v7 = vpop.xlane.xlu1 %678 }
 0x407   : > { %696 = vxpose.xlu1.b32.cont [15/16] (narrow) %v679_v7, 8 }
 0x40b   : > { %697 = vxpose.xlu1.b32.end [16/16] (narrow) %v681_v8, 8 }
 0x44f   : > { %v698_v9 = vpop.trf.xlu1 }
 0x450   : > { %1296 = vrcp.f32 %v698_v9 }
 0x45a   : > { %v1297_v13 = vpop.eup %1296 }
 0x45b   : > { %v718_v14 = vrot.slane %v1297_v13, %v717_v12 }
 0x45d   : > { %v719_v15 = vmul.f32 %v718_v14, %v321_v55  ;;  %v720_v16 = vmul.f32 %v718_v14, %v323_v59 }
 0x45f   : > { %1139 = vmatprep.mubr.f32.mxu0 %v719_v15 }
 0x460   : > { %1140 = vmatmul.mubr.f32.vlgmr.msra.gmra.mrb[6].mxu0 %v720_v16 }
 0x533   : > { %v1141_v17 = vpop.f32.mrb[6].mxu0 }
 0x534   : > { %v789_v19 = vpop.f32.mrb[7].mxu0  ;;  %812 = vmatprep.subr.mxu1 %v1141_v17 }
 0x535   : > { %813 = vmatpush1.msra.mxu1 %v789_v19 }
 0x536   : > { %1035 = vmatmul.mubr.msk.f32.vlgmr.msra.gmra.mrb[16].mxu1 %vm233_vm0, %v807_v18 }
 0x609   : > { %v878_v20 = vpop.f32.mrb[16].mxu1 }
 0x60a   : > { %v885_v21 = vadd.f32 %v878_v20, %v1703_v2  ;;  %v880_v22 = vpop.f32.mrb[17].mxu1 }
 0x60b   : > { %v886_v23 = vadd.f32 %v880_v22, %v1701_v1 }
 0x60c   : > { %887 = vst [vmem:[%s223_s20] sm:$0xff] %v885_v21 }
 0x60d   : > { %888 = vst [vmem:[%s223_s20 + $0x8] sm:$0xff] %v886_v23 }
 0x60e   : > { %1397 = shalt.err (!%p1394_p10)
}
 0x60f   : > { %s1398_s29 = scalar_lea.hbm %s1770_s19, 256  ;;  %s1402_s4 = scalar_lea.hbm %s1823_s3, 512 }
 0x610   : > { %p1399_p3 = scmp.ne.s32.totalorder %s1770_s19, %s1398_s29  ;;  %p1403_p5 = scmp.lt.u32.totalorder %s1770_s19, %s1823_s3 }
 0x611   : > { %p1404_p4 = scmp.lt.u32.totalorder %s1402_s4, %s1398_s29  ;;  %p1406_p9 = scmp.lt.u32.totalorder %s1398_s29, %s1770_s19 }
 0x612   : > { %p1400_p2 = pnand %p1399_p3, %p1839_p11 }
 0x613   : > { %p1405_p8 = por %p1404_p4, %p1403_p5 }
 0x614   : > { %p1401_p13 = pneg %p1400_p2 }
 0x615   : > { %p1407_p7 = por %p1406_p9, %p1405_p8 }
 0x617   : > { %p1408_p12 = pnand %p1407_p7, %p1401_p13 }
 0x619   : > { %1411 = shalt.err (!%p1408_p12)
}
 0x61a   : > { %1188 = dma.vmem_to_hbm [thread:$0]  (%p1839_p11), %s1772_s7, 256, %s1770_s19, %s890_s15  }
 0x61b PF: > { %s916_s6 = sand.u32 1, %s1454_s12   ;;  %p1840_p0 = scmp.ne.s32.totalorder %s1828_s21, 0 }
 0x61c   : > { %p1841_p1 = scmp.ge.s32.totalorder %s1474_s17, 2  ;;  %s917_s18 = scalar_lea.sflag [#allocation6], %s916_s6 }
 0x61e   : > { %p1202_p6 = pnand %p1841_p1, %p1840_p0 }
 0x620   : > { %1449 = dma.done.wait (!%p1202_p6), %s917_s18, 256  }
 0x621   : > { %1451 = vsyncadd (!%p1202_p6), %s917_s18, 4294967040  ;;  %s18_s17 = sadd.s32 1, %s1474_s17   ;;  %s1842_s12 = smov %s1458_s13 }
 0x622   : > { %p15_p10 = scmp.ge.s32.totalorder %s18_s17, 4   ;;  %s1843_s13 = smov %s1462_s14 }
 0x623   : > { %s1844_s14 = smov %s1642_s23  ;;  %s1845_s15 = smov %s1470_s16 }
 0x624   : > { %s1846_s16 = smov %s1848_s8  ;;  %17 = sbr.rel (!%p15_p10) target bundleno = 6 (0x6), region = 93 }
 0x62b   :  { %922 = vsyncpa [#allocation5], 1 }
 0x62c   :  { %924 = vsyncpa [#allocation5 + $0x1], 1 }
 0x62d   :  { %925 = vsyncpa [#allocation8], 1 }
 0x62e   :  { %926 = vsyncpa [#allocation6], 1 }
 0x62f   :  { %928 = vsyncpa [#allocation6 + $0x1], 1 }

</bundles_post_ra>
